<compile_context>
chip_gen: v7x
topology: tpu7x:2x2x1
jax: 0.10.0
libtpu: 0.0.40
codegen_flags: <defaults>
</compile_context>

<pallas_src>
import functools
import numpy as np
import jax
import jax.numpy as jnp
from jax.experimental import pallas as pl
from jax.experimental.pallas import tpu as pltpu


def _round_up(x, m):
    return ((x + m - 1) // m) * m


def _vmem_capacity_bytes():
    try:
        return int(pltpu.get_tpu_info().vmem_capacity_bytes)
    except Exception:
        return 64 * 1024 * 1024          # conservative (v7x-sized) fallback


def _tile_plan(n, c, hw):
    """Pick (tile_n, vmem_limit_bytes) for the (N, C, HW) input."""
    vmem = _vmem_capacity_bytes()
    if vmem >= 128 * 1024 * 1024:        # v5e / v6e: 128 MiB physical VMEM
        per_buffer = 14 * 1024 * 1024
        vmem_limit = 64 * 1024 * 1024
    else:                                # v7x: 64 MiB physical VMEM
        per_buffer = 6 * 1024 * 1024
        vmem_limit = 48 * 1024 * 1024

    if n <= 8:
        return max(n, 1), vmem_limit

    # per-proposal VMEM footprint (sublane / lane padded layout)
    row_bytes = _round_up(c, 8) * _round_up(hw, 128) * 4
    rows = max(8, per_buffer // row_bytes)
    rows = min(rows, 1024, _round_up(n, 8))
    if n >= 16:
        # keep >= 2 grid steps: pipelining + both v7x TensorCores engage
        rows = min(rows, max(8, _round_up((n + 1) // 2, 8)))
    if rows >= 128:
        rows = (rows // 128) * 128       # whole MXU passes on the M dim
    else:
        rows = max(8, (rows // 8) * 8)
    return rows, vmem_limit


# ---------------------------------------------------------------------------
# Kernel 1 (hot path): in-kernel avg-pool (lane sum, scale folded into the
# weights) + fused cls/det Linear heads.
#   x_ref: (tile_n, C, HW)   w_ref: (C, 2*K_pad)   b_ref: (1, 2*K_pad)
#   out_ref: (tile_n, 2*K_pad)   cls in lanes [0,K_pad), det in [K_pad,2K_pad)
# ---------------------------------------------------------------------------
def _wsddn_heads_train_kernel(x_ref, w_ref, b_ref, out_ref):
    feat = jnp.sum(x_ref[...], axis=2)                      # (tile_n, C)
    out_ref[...] = (jnp.dot(feat, w_ref[...],
                            preferred_element_type=jnp.float32) + b_ref[...])


def _wsddn_heads_eval_kernel(x_ref, w_ref, b_ref, out_ref, *,
                             num_classes, k_pad):
    feat = jnp.sum(x_ref[...], axis=2)                      # (tile_n, C)
    logits = (jnp.dot(feat, w_ref[...],
                      preferred_element_type=jnp.float32) + b_ref[...])
    # class softmax (dim=1) fused into the epilogue, padded lanes masked out
    cls = logits[:, :k_pad]
    lane = jax.lax.broadcasted_iota(jnp.int32, cls.shape, 1)
    cls = jnp.where(lane < num_classes, cls, jnp.float32(-1e30))
    cls = cls - jnp.max(cls, axis=1, keepdims=True)
    e = jnp.exp(cls)                                        # padded lanes -> 0
    inv = pl.reciprocal(jnp.sum(e, axis=1, keepdims=True), approx=False)
    out_ref[:, :k_pad] = e * inv                            # 128-aligned store
    out_ref[:, k_pad:] = logits[:, k_pad:]                  # raw det logits


def _build_fused_params(cls_w, cls_b, det_w, det_b, hw, k_pad):
    K, C = cls_w.shape
    inv_hw = 1.0 / float(hw)
    w = jnp.zeros((C, 2 * k_pad), jnp.float32)
    w = w.at[:, :K].set(cls_w.T.astype(jnp.float32) * inv_hw)
    w = w.at[:, k_pad:k_pad + K].set(det_w.T.astype(jnp.float32) * inv_hw)
    b = jnp.zeros((1, 2 * k_pad), jnp.float32)
    b = b.at[0, :K].set(cls_b.astype(jnp.float32))
    b = b.at[0, k_pad:k_pad + K].set(det_b.astype(jnp.float32))
    return w, b


def wsddn_heads(x3, w, b, *, training, num_classes, k_pad):
    """x3: (N, C, HW) float32 (free reshape of the NCHW input)."""
    N, C, HW = x3.shape
    tile_n, vmem_limit = _tile_plan(N, C, HW)
    grid_n = pl.cdiv(N, tile_n)

    kernel = (_wsddn_heads_train_kernel if training else
              functools.partial(_wsddn_heads_eval_kernel,
                                num_classes=num_classes, k_pad=k_pad))

    cost = pl.CostEstimate(
        flops=N * C * HW + 2 * N * C * (2 * k_pad),
        transcendentals=0 if training else N * k_pad,
        bytes_accessed=(N * C * HW * 4 + N * 2 * k_pad * 4
                        + C * 2 * k_pad * 4 + 2 * k_pad * 4),
    )

    return pl.pallas_call(
        kernel,
        out_shape=jax.ShapeDtypeStruct((N, 2 * k_pad), jnp.float32),
        grid=(grid_n,),
        in_specs=[
            pl.BlockSpec((tile_n, C, HW), lambda i: (i, 0, 0)),
            pl.BlockSpec((C, 2 * k_pad), lambda i: (0, 0)),
            pl.BlockSpec((1, 2 * k_pad), lambda i: (0, 0)),
        ],
        out_specs=pl.BlockSpec((tile_n, 2 * k_pad), lambda i: (i, 0)),
        compiler_params=pltpu.CompilerParams(
            dimension_semantics=("parallel",),
            vmem_limit_bytes=vmem_limit),
        cost_estimate=cost,
    )(x3, w, b)


# ---------------------------------------------------------------------------
# Kernel 2 (eval only, cold path): per-image softmax over proposals (dim=0).
# One (N,1) int32 seg-id input; per-segment max stabilization via a tiny
# unrolled loop over images (num_images is small).
# ---------------------------------------------------------------------------
def _wsddn_det_softmax_kernel(seg_ref, det_ref, out_ref, *, num_images):
    det = det_ref[...]                                      # (N, K_pad) f32
    seg = seg_ref[...]                                      # (N, 1) int32
    out = jnp.zeros_like(det)
    for g in range(num_images):                             # trace-time unroll
        mask = seg == g
        m = jnp.max(jnp.where(mask, det, jnp.float32(-1e30)),
                    axis=0, keepdims=True)                  # per-segment max
        e = jnp.where(mask, jnp.exp(det - m), jnp.float32(0.0))
        s = jnp.sum(e, axis=0, keepdims=True)
        s = jnp.where(s > 0.0, s, jnp.float32(1.0))         # empty-seg guard
        out = out + e * pl.reciprocal(s, approx=False)
    out_ref[...] = out


def wsddn_det_softmax(det_slab, seg_ids, num_images):
    n, kp = det_slab.shape
    kernel = functools.partial(_wsddn_det_softmax_kernel, num_images=num_images)
    return pl.pallas_call(
        kernel,
        out_shape=jax.ShapeDtypeStruct((n, kp), jnp.float32),
        grid=(1,),
        in_specs=[
            pl.BlockSpec((n, 1), lambda i: (0, 0)),
            pl.BlockSpec((n, kp), lambda i: (0, 0)),
        ],
        out_specs=pl.BlockSpec((n, kp), lambda i: (0, 0)),
    )(seg_ids.reshape(n, 1).astype(jnp.int32), det_slab.astype(jnp.float32))


# ---------------------------------------------------------------------------
# Module forward: mirrors WSDDNPredictor.forward -> (cls, final_det, None)
# ---------------------------------------------------------------------------
def wsddn_predictor_forward(x_nchw, proposal_counts, params, training=True):
    N, C, H, W = x_nchw.shape
    HW = H * W
    K = params["cls_w"].shape[0]
    k_pad = _round_up(K, 128)

    x3 = x_nchw.reshape(N, C, HW).astype(jnp.float32)       # free reshape
    w, b = _build_fused_params(params["cls_w"], params["cls_b"],
                               params["det_w"], params["det_b"], HW, k_pad)

    slab = wsddn_heads(x3, w, b, training=training,
                       num_classes=K, k_pad=k_pad)           # (N, 2*k_pad)
    cls = slab[:, :K]
    det_raw = slab[:, k_pad:k_pad + K]
    if training:
        return cls, det_raw, None

    # eval: cls softmax is already fused in kernel 1; det needs the per-image
    # (segmented, dim=0) proposal softmax.  proposal_counts are Python ints
    # (len(p) per image in the torch module), so seg ids are trace-time consts.
    seg_ids = np.concatenate(
        [np.full(c, g, dtype=np.int32) for g, c in enumerate(proposal_counts)])
    assert seg_ids.shape[0] == N
    det_sm = wsddn_det_softmax(slab[:, k_pad:], jnp.asarray(seg_ids),
                               len(proposal_counts))
    return cls, det_sm[:, :K], None


def _reference(x_nchw, proposal_counts, params, training):
    N, C, H, W = x_nchw.shape
    feat = x_nchw.reshape(N, C, H * W).mean(-1)
    cls = feat @ params["cls_w"].T + params["cls_b"]
    det = feat @ params["det_w"].T + params["det_b"]
    if training:
        return cls, det
    cls_sm = jax.nn.softmax(cls, axis=1)
    parts, start = [], 0
    for c in proposal_counts:
        parts.append(jax.nn.softmax(det[start:start + c], axis=0))
        start += c
    return cls_sm, jnp.concatenate(parts, axis=0)


if __name__ == "__main__":
    # Small synthetic shapes: 8 proposals total (3 + 5 over 2 images),
    # in_channels=32, 4x4 ROI features, 16 classes.
    N, C, H, W, K = 8, 32, 4, 4, 16
    proposal_counts = [3, 5]

    key = jax.random.PRNGKey(0)
    kx, kc, kd = jax.random.split(key, 3)
    x = jax.random.normal(kx, (N, C, H, W), dtype=jnp.float32)

    # WSDDNPredictor._initialize_weights: normal(mean=0, std=0.001), bias=0.
    params = {
        "cls_w": 0.001 * jax.random.normal(kc, (K, C), dtype=jnp.float32),
        "cls_b": jnp.zeros((K,), dtype=jnp.float32),
        "det_w": 0.001 * jax.random.normal(kd, (K, C), dtype=jnp.float32),
        "det_b": jnp.zeros((K,), dtype=jnp.float32),
    }

    # training mode (module default): raw logits
    cls_tr, det_tr, _ = wsddn_predictor_forward(
        x, proposal_counts, params, training=True)
    jax.block_until_ready((cls_tr, det_tr))

    # eval mode: class softmax + per-image proposal softmax
    cls_ev, det_ev, _ = wsddn_predictor_forward(
        x, proposal_counts, params, training=False)
    jax.block_until_ready((cls_ev, det_ev))

    # correctness check vs pure-JAX reference
    r_cls_tr, r_det_tr = _reference(x, proposal_counts, params, True)
    r_cls_ev, r_det_ev = _reference(x, proposal_counts, params, False)
    np.testing.assert_allclose(np.asarray(cls_tr), np.asarray(r_cls_tr),
                               rtol=1e-5, atol=1e-6)
    np.testing.assert_allclose(np.asarray(det_tr), np.asarray(r_det_tr),
                               rtol=1e-5, atol=1e-6)
    np.testing.assert_allclose(np.asarray(cls_ev), np.asarray(r_cls_ev),
                               rtol=1e-5, atol=1e-6)
    np.testing.assert_allclose(np.asarray(det_ev), np.asarray(r_det_ev),
                               rtol=1e-5, atol=1e-6)

    print("KERNEL_OK")
</pallas_src>

<mosaic_0001>
module attributes {stable_mosaic.version = 11 : i64} {
  func.func @_wsddn_heads_train_kernel(%arg0: i32, %arg1: memref<8x32x16xf32, #tpu.memory_space<vmem>>, %arg2: memref<32x256xf32, #tpu.memory_space<vmem>>, %arg3: memref<1x256xf32, #tpu.memory_space<vmem>>, %arg4: memref<8x256xf32, #tpu.memory_space<vmem>>) attributes {dimension_semantics = [#tpu.dimension_semantics<parallel>], iteration_bounds = array<i64: 1>, scalar_prefetch = 0 : i64, scratch_operands = 0 : i64, tpu.core_type = #tpu.core_type<tc>, window_params = [{transform_indices = @transform_0, window_bounds = array<i64: 8, 32, 16>}, {pipeline_mode = #tpu.pipeline_mode<synchronous>, transform_indices = @transform_1, window_bounds = array<i64: 32, 256>}, {pipeline_mode = #tpu.pipeline_mode<synchronous>, transform_indices = @transform_2, window_bounds = array<i64: 1, 256>}, {transform_indices = @transform_3, window_bounds = array<i64: 8, 256>}]} {
    %c0 = arith.constant 0 : index
    %c0_0 = arith.constant 0 : index
    %c0_1 = arith.constant 0 : index
    %0 = vector.load %arg1[%c0, %c0_0, %c0_1] : memref<8x32x16xf32, #tpu.memory_space<vmem>>, vector<8x32x16xf32>
    %cst = arith.constant dense<0.000000e+00> : vector<8x32xf32>
    %1 = vector.multi_reduction <add>, %0, %cst [2] : vector<8x32x16xf32> to vector<8x32xf32>
    %c0_2 = arith.constant 0 : index
    %c0_3 = arith.constant 0 : index
    %2 = vector.load %arg2[%c0_2, %c0_3] : memref<32x256xf32, #tpu.memory_space<vmem>>, vector<32x256xf32>
    %cst_4 = arith.constant dense<0.000000e+00> : vector<8x256xf32>
    %3 = tpu.matmul %1, %2, %cst_4 {dimension_numbers = #tpu.dot_dimension_numbers<[1], [0], [0], [1], [0, 0, 1, 1], [], []>} : vector<8x32xf32>, vector<32x256xf32>, vector<8x256xf32> -> vector<8x256xf32>
    %c0_5 = arith.constant 0 : index
    %c0_6 = arith.constant 0 : index
    %4 = vector.load %arg3[%c0_5, %c0_6] : memref<1x256xf32, #tpu.memory_space<vmem>>, vector<1x256xf32>
    %5 = vector.broadcast %4 : vector<1x256xf32> to vector<8x256xf32>
    %6 = arith.addf %3, %5 : vector<8x256xf32>
    %c0_7 = arith.constant 0 : index
    %c0_8 = arith.constant 0 : index
    %7 = vector.load %arg4[%c0_7, %c0_8] : memref<8x256xf32, #tpu.memory_space<vmem>>, vector<8x256xf32>
    tpu.vector_store %arg4[%c0_7, %c0_8], %6 {strides = array<i32>} : memref<8x256xf32, #tpu.memory_space<vmem>>, vector<8x256xf32>,
    return
  }
  func.func @transform_0(%arg0: i32) -> (i32, i32, i32) {
    %c0_i32 = arith.constant 0 : i32
    %c0_i32_0 = arith.constant 0 : i32
    %c0_i32_1 = arith.constant 0 : i32
    return %arg0, %c0_i32, %c0_i32_0 : i32, i32, i32
  }
  func.func @transform_1(%arg0: i32) -> (i32, i32) {
    %c0_i32 = arith.constant 0 : i32
    %c0_i32_0 = arith.constant 0 : i32
    %c0_i32_1 = arith.constant 0 : i32
    return %c0_i32, %c0_i32_0 : i32, i32
  }
  func.func @transform_2(%arg0: i32) -> (i32, i32) {
    %c0_i32 = arith.constant 0 : i32
    %c0_i32_0 = arith.constant 0 : i32
    %c0_i32_1 = arith.constant 0 : i32
    return %c0_i32, %c0_i32_0 : i32, i32
  }
  func.func @transform_3(%arg0: i32) -> (i32, i32) {
    %c0_i32 = arith.constant 0 : i32
    %c0_i32_0 = arith.constant 0 : i32
    return %arg0, %c0_i32 : i32, i32
  }
}

</mosaic_0001>

<bundles_post_ra>
// kernel: tpu_custom_call.1
= control target key start
LH: loop header
LB: loop body
LE: loop exit
PB: predicated region body
PF: predicated region fallthrough
CT: control target
= control target key end

     0   :  { %vm47_vm0 = vcmask 130048   ;;  %s798_s0 = inlined_call_operand.vmem [shape: f32[8,32,16], index: 0, kind: input, shape index: {}]   ;;  %s799_s1 = inlined_call_operand.vmem [shape: f32[32,256], index: 1, kind: input, shape index: {}]   ;;  %s800_s2 = inlined_call_operand.vmem [shape: f32[1,256], index: 2, kind: input, shape index: {}]   ;;  %s801_s3 = inlined_call_operand.hbm [shape: f32[8,256], index: 3, kind: output, shape index: {}]  }
   0x1   :  { %v19_v0 = vld [vmem:[%s798_s0 + $0x20] sm:$0xff]  ;;  %v20_v2 = vld [vmem:[%s798_s0 + $0x28] sm:$0xff]  ;;  %v21_v8 = vld [vmem:[%s798_s0 + $0x30] sm:$0xff] }
   0x2   :  { %v15_v1 = vld [vmem:[%s798_s0] sm:$0xff]  ;;  %v60_v3 = vsel %vm47_vm0, %v19_v0, 0.0  ;;  %v16_v5 = vld [vmem:[%s798_s0 + $0x8] sm:$0xff]  ;;  %v63_v6 = vsel %vm47_vm0, %v20_v2, 0.0  ;;  %v17_v9 = vld [vmem:[%s798_s0 + $0x10] sm:$0xff]  ;;  %v66_v10 = vsel %vm47_vm0, %v21_v8, 0.0 }
   0x3   :  { %v48_v4 = vsel %vm47_vm0, %v15_v1, 0.0  ;;  %61 = vadd.xlane.f32.xlu1 %v60_v3  ;;  %v51_v7 = vsel %vm47_vm0, %v16_v5, 0.0  ;;  %v54_v11 = vsel %vm47_vm0, %v17_v9, 0.0  ;;  %v24_v12 = vld [vmem:[%s798_s0 + $0x48] sm:$0xff]  ;;  %v23_v13 = vld [vmem:[%s798_s0 + $0x40] sm:$0xff] }
   0x4   :  { %49 = vadd.xlane.f32.xlu0 %v48_v4  ;;  %v75_v14 = vsel %vm47_vm0, %v24_v12, 0.0  ;;  %v72_v15 = vsel %vm47_vm0, %v23_v13, 0.0 }
   0x7   :  { %64 = vadd.xlane.f32.xlu1 %v63_v6 }
   0x8   :  { %52 = vadd.xlane.f32.xlu0 %v51_v7 }
   0xb   :  { %67 = vadd.xlane.f32.xlu1 %v66_v10 }
   0xc   :  { %55 = vadd.xlane.f32.xlu0 %v54_v11 }
   0xd   :  { %8 = vsyncpa [#allocation3], 0  ;;  %v22_v16 = vld [vmem:[%s798_s0 + $0x38] sm:$0xff]  ;;  %v27_v20 = vld [vmem:[%s798_s0 + $0x60] sm:$0xff]  ;;  %v495_v12 = vmov 0.0   ;;  %vm207_vm1 = vcmask 130112  }
   0xe   :  { %v18_v17 = vld [vmem:[%s798_s0 + $0x18] sm:$0xff]  ;;  %v69_v18 = vsel %vm47_vm0, %v22_v16, 0.0  ;;  %v25_v21 = vld [vmem:[%s798_s0 + $0x50] sm:$0xff]  ;;  %v84_v22 = vsel %vm47_vm0, %v27_v20, 0.0  ;;  %v28_v25 = vld [vmem:[%s798_s0 + $0x68] sm:$0xff]  ;;  %437 = vmatprep.mubr.f32.mxu0 %v495_v12  ;;  %vm214_vm2 = vcmask 195712  }
   0xf   :  { %76 = vadd.xlane.f32.xlu1 %v75_v14  ;;  %v57_v19 = vsel %vm47_vm0, %v18_v17, 0.0  ;;  %v78_v23 = vsel %vm47_vm0, %v25_v21, 0.0  ;;  %v26_v24 = vld [vmem:[%s798_s0 + $0x58] sm:$0xff]  ;;  %v87_v27 = vsel %vm47_vm0, %v28_v25, 0.0  ;;  %v31_v28 = vld [vmem:[%s798_s0 + $0x80] sm:$0xff]  ;;  %v29_v29 = vld [vmem:[%s798_s0 + $0x70] sm:$0xff] }
  0x10   :  { %73 = vadd.xlane.f32.xlu0 %v72_v15  ;;  %v81_v26 = vsel %vm47_vm0, %v26_v24, 0.0  ;;  %v96_v30 = vsel %vm47_vm0, %v31_v28, 0.0  ;;  %v90_v31 = vsel %vm47_vm0, %v29_v29, 0.0  ;;  %v30_v32 = vld [vmem:[%s798_s0 + $0x78] sm:$0xff]  ;;  %v32_v33 = vld [vmem:[%s798_s0 + $0x88] sm:$0xff]  ;;  %v35_v36 = vld [vmem:[%s798_s0 + $0xa0] sm:$0xff]  ;;  %v154_v29 = vlaneseq }
  0x11   :  { %v93_v34 = vsel %vm47_vm0, %v30_v32, 0.0  ;;  %v99_v35 = vsel %vm47_vm0, %v32_v33, 0.0  ;;  %v33_v37 = vld [vmem:[%s798_s0 + $0x90] sm:$0xff]  ;;  %v108_v38 = vsel %vm47_vm0, %v35_v36, 0.0  ;;  %v34_v40 = vld [vmem:[%s798_s0 + $0x98] sm:$0xff]  ;;  %v36_v41 = vld [vmem:[%s798_s0 + $0xa8] sm:$0xff] }
  0x12   :  { %v102_v39 = vsel %vm47_vm0, %v33_v37, 0.0  ;;  %v105_v42 = vsel %vm47_vm0, %v34_v40, 0.0  ;;  %v111_v43 = vsel %vm47_vm0, %v36_v41, 0.0  ;;  %v39_v44 = vld [vmem:[%s798_s0 + $0xc0] sm:$0xff]  ;;  %v37_v45 = vld [vmem:[%s798_s0 + $0xb0] sm:$0xff]  ;;  %v38_v48 = vld [vmem:[%s798_s0 + $0xb8] sm:$0xff] }
  0x13   :  { %70 = vadd.xlane.f32.xlu1 %v69_v18  ;;  %v120_v46 = vsel %vm47_vm0, %v39_v44, 0.0  ;;  %v114_v47 = vsel %vm47_vm0, %v37_v45, 0.0  ;;  %v40_v49 = vld [vmem:[%s798_s0 + $0xc8] sm:$0xff]  ;;  %v117_v50 = vsel %vm47_vm0, %v38_v48, 0.0  ;;  %v43_v52 = vld [vmem:[%s798_s0 + $0xe0] sm:$0xff]  ;;  %v41_v53 = vld [vmem:[%s798_s0 + $0xd0] sm:$0xff] }
  0x14   :  { %58 = vadd.xlane.f32.xlu0 %v57_v19  ;;  %v123_v51 = vsel %vm47_vm0, %v40_v49, 0.0  ;;  %v132_v54 = vsel %vm47_vm0, %v43_v52, 0.0  ;;  %v126_v55 = vsel %vm47_vm0, %v41_v53, 0.0  ;;  %v42_v56 = vld [vmem:[%s798_s0 + $0xd8] sm:$0xff]  ;;  %v44_v57 = vld [vmem:[%s798_s0 + $0xe8] sm:$0xff]  ;;  %v45_v60 = vld [vmem:[%s798_s0 + $0xf0] sm:$0xff] }
  0x15   :  { %v129_v58 = vsel %vm47_vm0, %v42_v56, 0.0  ;;  %v135_v59 = vsel %vm47_vm0, %v44_v57, 0.0  ;;  %v46_v61 = vld [vmem:[%s798_s0 + $0xf8] sm:$0xff]  ;;  %v138_v62 = vsel %vm47_vm0, %v45_v60, 0.0  ;;  %v145_v0 = vld [vmem:[%s799_s1 + $0x8] sm:$0xff]  ;;  %v144_v3 = vld [vmem:[%s799_s1] sm:$0xff] }
  0x16   :  { %v141_v63 = vsel %vm47_vm0, %v46_v61, 0.0  ;;  %v147_v1 = vld [vmem:[%s799_s1 + $0x18] sm:$0xff]  ;;  %v146_v4 = vld [vmem:[%s799_s1 + $0x10] sm:$0xff]  ;;  %v149_v6 = vld [vmem:[%s799_s1 + $0x28] sm:$0xff]  ;;  %v197_v32 = vand.u32 127, %v154_v29  ;;  %v685_v36 = vshrl.u32 %v154_v29, 7 }
  0x17   :  { %85 = vadd.xlane.f32.xlu1 %v84_v22  ;;  %v461_v2 = vpack.c.bf16 %v147_v1, %v145_v0  ;;  %v463_v5 = vpack.c.bf16 %v146_v4, %v144_v3  ;;  %v151_v7 = vld [vmem:[%s799_s1 + $0x38] sm:$0xff]  ;;  %v148_v9 = vld [vmem:[%s799_s1 + $0x20] sm:$0xff]  ;;  %v150_v10 = vld [vmem:[%s799_s1 + $0x30] sm:$0xff]  ;;  %vm221_vm3 = vcmask 261312   ;;  %vm356_vm4 = vcmask 1041409   ;;  %s496_s11 = smov [#allocation2]  }
  0x18   :  { %79 = vadd.xlane.f32.xlu0 %v78_v23  ;;  %v465_v8 = vpack.c.bf16 %v151_v7, %v149_v6  ;;  %v467_v11 = vpack.c.bf16 %v150_v10, %v148_v9  ;;  %v209_v37 = vadd.s32 4294967280, %v197_v32  ;;  %vm358_vm5 = vcmask 1042434   ;;  %s452_s12 = sshll.u32 %s496_s11, 4  ;;  %s453_s12 = int_to_ptr.vmem [resolvable:$true] %s452_s12 }
  0x19   :  { %462 = vmatprep.subr.bf16.mxu0 %v461_v2  ;;  %vm360_vm6 = vcmask 1043459   ;;  %vm362_vm7 = vcmask 1044484   ;;  %vm364_vm8 = vcmask 1045509   ;;  %vm366_vm9 = vcmask 1046534   ;;  %s471_s13 = scalar_lea.vmem %s453_s12, 256  ;;  %p476_p1 = scmp.lt.s32.totalorder %s453_s12, %s453_s12 }
  0x1a   :  { %464 = vmatpush1.bf16.msra.mxu0 %v463_v5  ;;  %vm368_vm10 = vcmask 1047559   ;;  %vm370_vm11 = vcmask 261120   ;;  %p472_p0 = scmp.ne.s32.totalorder %s453_s12, %s471_s13  ;;  %p477_p2 = scmp.lt.s32.totalorder %s471_s13, %s471_s13 }
  0x1b   :  { %82 = vadd.xlane.f32.xlu1 %v81_v26  ;;  %466 = vmatprep.subr.bf16.mxu0 %v465_v8 }
  0x1c   :  { %88 = vadd.xlane.f32.xlu0 %v87_v27  ;;  %p478_p3 = por %p477_p2, %p476_p1 }
  0x1e   :  { %468 = vmatpush1.bf16.msra.mxu0 %v467_v11  ;;  %p479_p4 = pnand %p478_p3, %p472_p0 }
  0x1f   :  { %97 = vadd.xlane.f32.xlu1 %v96_v30 }
  0x20   :  { %91 = vadd.xlane.f32.xlu0 %v90_v31 }
  0x23   :  { %94 = vadd.xlane.f32.xlu1 %v93_v34 }
  0x24   :  { %100 = vadd.xlane.f32.xlu0 %v99_v35  ;;  %v202_v35 = vadd.s32 4294967288, %v197_v32 }
  0x26   :  { %v692_v41 = vsub.s32 %v202_v35, %v685_v36 }
  0x27   :  { %109 = vadd.xlane.f32.xlu1 %v108_v38  ;;  %v216_v38 = vadd.s32 4294967272, %v197_v32 }
  0x28   :  { %103 = vadd.xlane.f32.xlu0 %v102_v39 }
  0x29   :  { %v701_v44 = vsub.s32 %v216_v38, %v685_v36 }
  0x2b   :  { %106 = vadd.xlane.f32.xlu1 %v105_v42  ;;  %v695_v42 = vsub.s32 %v197_v32, %v685_v36 }
  0x2c   :  { %112 = vadd.xlane.f32.xlu0 %v111_v43  ;;  %v698_v43 = vsub.s32 %v209_v37, %v685_v36 }
  0x2f   :  { %121 = vadd.xlane.f32.xlu1 %v120_v46 }
  0x30   :  { %115 = vadd.xlane.f32.xlu0 %v114_v47 }
  0x33   :  { %118 = vadd.xlane.f32.xlu1 %v117_v50 }
  0x34   :  { %124 = vadd.xlane.f32.xlu0 %v123_v51 }
  0x37   :  { %133 = vadd.xlane.f32.xlu1 %v132_v54 }
  0x38   :  { %127 = vadd.xlane.f32.xlu0 %v126_v55 }
  0x3b   :  { %130 = vadd.xlane.f32.xlu1 %v129_v58 }
  0x3c   :  { %136 = vadd.xlane.f32.xlu0 %v135_v59 }
  0x3f   :  { %142 = vadd.xlane.f32.xlu1 %v141_v63 }
  0x40   :  { %139 = vadd.xlane.f32.xlu0 %v138_v62 }
  0x90   :  { %v62_v13 = vpop.xlane.xlu1 %61 }
  0x91   :  { %v50_v14 = vpop.xlane.xlu0 %49  ;;  %v226_v49 = vrot.slane %v62_v13, %v695_v42 }
  0x92   :  { %v201_v50 = vrot.slane %v50_v14, %v695_v42 }
  0x94   :  { %v65_v15 = vpop.xlane.xlu1 %64 }
  0x95   :  { %v53_v16 = vpop.xlane.xlu0 %52  ;;  %v230_v47 = vrot.slane %v65_v15, %v692_v41 }
  0x96   :  { %v206_v48 = vrot.slane %v53_v16, %v692_v41 }
  0x97   :  { %v231_v60 = vsel %vm207_vm1, %v230_v47, %v226_v49 }
  0x98   :  { %v68_v17 = vpop.xlane.xlu1 %67  ;;  %v208_v61 = vsel %vm207_vm1, %v206_v48, %v201_v50 }
  0x99   :  { %v56_v18 = vpop.xlane.xlu0 %55  ;;  %v235_v51 = vrot.slane %v68_v17, %v698_v43 }
  0x9a   :  { %v213_v52 = vrot.slane %v56_v18, %v698_v43 }
  0x9b   :  { %v236_v63 = vsel %vm214_vm2, %v235_v51, %v231_v60 }
  0x9c   :  { %v77_v19 = vpop.xlane.xlu1 %76  ;;  %v215_v0 = vsel %vm214_vm2, %v213_v52, %v208_v61 }
  0x9d   :  { %v74_v20 = vpop.xlane.xlu0 %73  ;;  %v249_v53 = vrot.slane %v77_v19, %v692_v41 }
  0x9e   :  { %v245_v54 = vrot.slane %v74_v20, %v695_v42 }
  0xa0   :  { %v71_v21 = vpop.xlane.xlu1 %70  ;;  %v250_v1 = vsel %vm207_vm1, %v249_v53, %v245_v54 }
  0xa1   :  { %v59_v22 = vpop.xlane.xlu0 %58  ;;  %v240_v55 = vrot.slane %v71_v21, %v701_v44 }
  0xa2   :  { %v220_v56 = vrot.slane %v59_v22, %v701_v44 }
  0xa3   :  { %v241_v2 = vsel %vm221_vm3, %v240_v55, %v236_v63 }
  0xa4   :  { %v669_v23 = vpop.xlane.xlu1 %85  ;;  %v222_v3 = vsel %vm221_vm3, %v220_v56, %v215_v0 }
  0xa5   :  { %v80_v24 = vpop.xlane.xlu0 %79  ;;  %v264_v7 = vrot.slane %v669_v23, %v695_v42 }
  0xa6   :  { %v254_v59 = vrot.slane %v80_v24, %v698_v43 }
  0xa8   :  { %v83_v25 = vpop.xlane.xlu1 %82  ;;  %v255_v8 = vsel %vm214_vm2, %v254_v59, %v250_v1 }
  0xa9   :  { %v671_v26 = vpop.xlane.xlu0 %88  ;;  %v259_v62 = vrot.slane %v83_v25, %v701_v44 }
  0xaa   :  { %v268_v4 = vrot.slane %v671_v26, %v692_v41 }
  0xab   :  { %v260_v11 = vsel %vm221_vm3, %v259_v62, %v255_v8 }
  0xac   :  { %v673_v27 = vpop.xlane.xlu1 %97  ;;  %v269_v19 = vsel %vm207_vm1, %v268_v4, %v264_v7 }
  0xad   :  { %v675_v28 = vpop.xlane.xlu0 %91  ;;  %v283_v15 = vrot.slane %v673_v27, %v695_v42 }
  0xae   :  { %v273_v9 = vrot.slane %v675_v28, %v698_v43 }
  0xb0   :  { %v677_v30 = vpop.xlane.xlu1 %94  ;;  %v274_v25 = vsel %vm214_vm2, %v273_v9, %v269_v19 }
  0xb1   :  { %v679_v31 = vpop.xlane.xlu0 %100  ;;  %v278_v12 = vrot.slane %v677_v30, %v701_v44 }
  0xb2   :  { %v287_v10 = vrot.slane %v679_v31, %v692_v41 }
  0xb3   :  { %v279_v29 = vsel %vm221_vm3, %v278_v12, %v274_v25 }
  0xb4   :  { %v681_v33 = vpop.xlane.xlu1 %109  ;;  %v288_v26 = vsel %vm207_vm1, %v287_v10, %v283_v15 }
  0xb5   :  { %v683_v34 = vpop.xlane.xlu0 %103  ;;  %v302_v20 = vrot.slane %v681_v33, %v695_v42  ;;  %v357_v33 = vsel %vm356_vm4, %v241_v2, %v222_v3 }
  0xb6   :  { %v292_v13 = vrot.slane %v683_v34, %v698_v43  ;;  %v359_v38 = vsel %vm358_vm5, %v260_v11, %v357_v33 }
  0xb8   :  { %v687_v39 = vpop.xlane.xlu1 %106  ;;  %v293_v30 = vsel %vm214_vm2, %v292_v13, %v288_v26 }
  0xb9   :  { %v689_v40 = vpop.xlane.xlu0 %112  ;;  %v297_v16 = vrot.slane %v687_v39, %v701_v44 }
  0xba   :  { %v306_v14 = vrot.slane %v689_v40, %v692_v41 }
  0xbb   :  { %v298_v34 = vsel %vm221_vm3, %v297_v16, %v293_v30 }
  0xbc   :  { %v703_v45 = vpop.xlane.xlu1 %121  ;;  %v307_v31 = vsel %vm207_vm1, %v306_v14, %v302_v20 }
  0xbd   :  { %v705_v46 = vpop.xlane.xlu0 %115  ;;  %v321_v27 = vrot.slane %v703_v45, %v695_v42 }
  0xbe   :  { %v311_v17 = vrot.slane %v705_v46, %v698_v43 }
  0xc0   :  { %v119_v57 = vpop.xlane.xlu1 %118  ;;  %v312_v35 = vsel %vm214_vm2, %v311_v17, %v307_v31 }
  0xc1   :  { %v125_v58 = vpop.xlane.xlu0 %124  ;;  %v316_v21 = vrot.slane %v119_v57, %v701_v44  ;;  %v160_v57 = vsub.s32 1, %v685_v36 }
  0xc2   :  { %v325_v18 = vrot.slane %v125_v58, %v692_v41 }
  0xc3   :  { %v317_v39 = vsel %vm221_vm3, %v316_v21, %v312_v35 }
  0xc4   :  { %v134_v5 = vpop.xlane.xlu1 %133  ;;  %v326_v37 = vsel %vm207_vm1, %v325_v18, %v321_v27 }
  0xc5   :  { %v128_v6 = vpop.xlane.xlu0 %127  ;;  %v340_v40 = vrot.slane %v134_v5, %v695_v42 }
  0xc6   :  { %v330_v22 = vrot.slane %v128_v6, %v698_v43 }
  0xc8   :  { %v131_v23 = vpop.xlane.xlu1 %130  ;;  %v331_v45 = vsel %vm214_vm2, %v330_v22, %v326_v37 }
  0xc9   :  { %v137_v24 = vpop.xlane.xlu0 %136  ;;  %v335_v28 = vrot.slane %v131_v23, %v701_v44 }
  0xca   :  { %v344_v32 = vrot.slane %v137_v24, %v692_v41  ;;  %v361_v41 = vsel %vm360_vm6, %v279_v29, %v359_v38 }
  0xcb   :  { %v336_v48 = vsel %vm221_vm3, %v335_v28, %v331_v45  ;;  %v363_v51 = vsel %vm362_vm7, %v298_v34, %v361_v41 }
  0xcc   :  { %v143_v47 = vpop.xlane.xlu1 %142  ;;  %v345_v52 = vsel %vm207_vm1, %v344_v32, %v340_v40  ;;  %v365_v53 = vsel %vm364_vm8, %v317_v39, %v363_v51 }
  0xcd   :  { %v140_v46 = vpop.xlane.xlu0 %139  ;;  %v354_v50 = vrot.slane %v143_v47, %v701_v44  ;;  %v367_v55 = vsel %vm366_vm9, %v336_v48, %v365_v53  ;;  %v152_v44 = vld [vmem:[%s800_s2] sm:$0x3] }
  0xce   :  { %v349_v49 = vrot.slane %v140_v46, %v698_v43  ;;  %v156_v43 = vsub.s32 0, %v685_v36  ;;  %v161_v59 = vrot.slane %v152_v44, %v160_v57 }
  0xd0   :  { %v350_v42 = vsel %vm214_vm2, %v349_v49, %v345_v52  ;;  %v157_v58 = vrot.slane %v152_v44, %v156_v43 }
  0xd1   :  { %v355_v54 = vsel %vm221_vm3, %v354_v50, %v350_v42 }
  0xd2   :  { %v369_v56 = vsel %vm368_vm10, %v355_v54, %v367_v55 }
  0xd3   :  { %460 = vmatmul.mubr.msk.f32.vlgmr.msra.gmra.mrb[0].mxu0 %vm370_vm11, %v369_v56 }
 0x1a6   :  { %v439_v60 = vpop.f32.mrb[0].mxu0 }
 0x1a7   :  { %v440_v61 = vadd.f32 %v439_v60, %v157_v58  ;;  %v441_v62 = vpop.f32.mrb[1].mxu0 }
 0x1a8   :  { %v442_v63 = vadd.f32 %v441_v62, %v161_v59 }
 0x1a9   :  { %444 = vst [vmem:[#allocation2] sm:$0xff] %v440_v61 }
 0x1aa   :  { %445 = vst [vmem:[#allocation2 + $0x8] sm:$0xff] %v442_v63 }
 0x1ab   :  { %482 = shalt.err (!%p479_p4)
}
 0x1ac   :  { %s483_s15 = scalar_lea.hbm %s801_s3, 256 }
 0x1ad   :  { %p484_p5 = scmp.ne.s32.totalorder %s801_s3, %s483_s15  ;;  %p487_p6 = scmp.lt.u32.totalorder %s483_s15, %s801_s3 }
 0x1af   :  { %p489_p7 = pnand %p487_p6, %p484_p5 }
 0x1b1   :  { %492 = shalt.err (!%p489_p7)
}
 0x1b2   :  { %455 = dma.vmem_to_hbm [thread:$0]  %s453_s12, 256, %s801_s3, [#allocation3]  }
 0x1b3   :  { %493 = dma.done.wait [#allocation3], 256  }
 0x1b4   :  { %494 = vsyncadd [#allocation3], 4294967040 }
 0x1b5   :  { %459 = vsyncpa [#allocation3], 1 }

</bundles_post_ra>
